<compile_context>
chip_gen: v6e
topology: v6e:2x2x1
jax: 0.10.0
libtpu: 0.0.40
codegen_flags: <defaults>
</compile_context>

<pallas_src>
import functools

import jax
import jax.numpy as jnp
from jax import lax
from jax.experimental import pallas as pl
from jax.experimental.pallas import tpu as pltpu

LAYERS = [3, 32, 32, 2]          # args.layers, hamiltonian == 'output'
Q_MIN, Q_MAX = -1.0, 1.0         # args.q_min_max
P_MIN, P_MAX = -2.0, 2.0         # args.p_min_max
T_MIN, T_MAX = 0.0, 10.0         # args.t_min_max

TM_MAX = 4096                    # max batch-tile lanes per grid step


def _tpu_kind():
    try:
        return jax.devices()[0].device_kind.lower()
    except Exception:
        return ""


_KIND = _tpu_kind()
_TWO_TENSORCORES = ("v7" in _KIND) or ("7x" in _KIND)            # v7x: 2 TCs / chip
_USE_BF16_MATMUL = any(s in _KIND for s in ("v6", "v7", "7x"))   # bf16-native MXU
MIN_STEPS = 2 if _TWO_TENSORCORES else 1


def _pinn_kernel(xt_ref, w0_ref, b0_ref, w1_ref, b1_ref, w2_ref, b2_ref,
                 out_ref, *, mm_dtype):
    """One batch tile, feature-major: x (din, tm) -> out (dout, tm).

    Each dot_general contracts axis 0 of both operands (weight transposed-LHS,
    activation feature-leading) so the MXU consumes them natively; accumulation,
    bias add and tanh stay in f32.  mm_dtype=bf16 on v6e/v7x, f32 elsewhere.
    """
    cdims = (((0,), (0,)), ((), ()))
    z = lax.dot_general(w0_ref[...].astype(mm_dtype), xt_ref[...].astype(mm_dtype),
                        cdims, preferred_element_type=jnp.float32)   # (h1, tm)
    a = jnp.tanh(z + b0_ref[...])
    z = lax.dot_general(w1_ref[...].astype(mm_dtype), a.astype(mm_dtype),
                        cdims, preferred_element_type=jnp.float32)   # (h2, tm)
    a = jnp.tanh(z + b1_ref[...])
    z = lax.dot_general(w2_ref[...].astype(mm_dtype), a.astype(mm_dtype),
                        cdims, preferred_element_type=jnp.float32)   # (dout, tm)
    out_ref[...] = z + b2_ref[...]


def _choose_tm(n):
    """Largest 128-multiple tile <= TM_MAX leaving >= MIN_STEPS grid steps."""
    tm = -(-n // MIN_STEPS)            # ceil(n / MIN_STEPS)
    tm = ((tm + 127) // 128) * 128     # lane-friendly tile width
    return max(128, min(TM_MAX, tm))


@jax.jit
def pinn_forward(q, p, t, params, lb, ub):
    """q, p, t: (N, 1) float32. Returns (N, LAYERS[-1]) float32."""
    din, h1, h2, dout = LAYERS

    # Build the input feature-major (din, N): batch is the lane axis, so the
    # kernel's input DMA / loads are unmasked and full-lane.  q/p/t are column
    # vectors, so these reshapes are free (no transpose op needed).
    u_t = jnp.concatenate(
        [q.reshape(1, -1), p.reshape(1, -1), t.reshape(1, -1)],
        axis=0).astype(jnp.float32)                                  # (din, N)
    n = u_t.shape[1]

    (w0, b0), (w1, b1), (w2, b2) = params

    # Fold (u - lb)/(ub - lb) = u*scale + offset into layer 0:
    #   (u*scale + offset) @ w0 + b0 = u @ (scale.T * w0) + (offset @ w0 + b0)
    scale = 1.0 / (ub - lb)                                          # (1, din)
    offset = -lb * scale                                             # (1, din)
    w0_eff = w0 * scale.reshape(din, 1)                              # (din, h1)
    b0_eff = (offset @ w0 + b0.reshape(1, -1)).reshape(h1, 1)        # (h1, 1)
    b1_c = b1.reshape(h2, 1)                                         # (h2, 1)
    b2_c = b2.reshape(dout, 1)                                       # (dout, 1)

    tm = _choose_tm(n)
    grid = (pl.cdiv(n, tm),)   # ragged last block: tail lanes masked / discarded
    mm_dtype = jnp.bfloat16 if _USE_BF16_MATMUL else jnp.float32

    out_t = pl.pallas_call(
        functools.partial(_pinn_kernel, mm_dtype=mm_dtype),
        out_shape=jax.ShapeDtypeStruct((dout, n), jnp.float32),
        grid_spec=pltpu.PrefetchScalarGridSpec(
            num_scalar_prefetch=0,
            grid=grid,
            in_specs=[
                pl.BlockSpec((din, tm), lambda i: (0, i)),    # x tile (lane-dense)
                pl.BlockSpec((din, h1), lambda i: (0, 0)),    # w0 (norm folded in)
                pl.BlockSpec((h1, 1), lambda i: (0, 0)),      # b0 (norm folded in)
                pl.BlockSpec((h1, h2), lambda i: (0, 0)),     # w1
                pl.BlockSpec((h2, 1), lambda i: (0, 0)),      # b1
                pl.BlockSpec((h2, dout), lambda i: (0, 0)),   # w2
                pl.BlockSpec((dout, 1), lambda i: (0, 0)),    # b2
            ],
            out_specs=pl.BlockSpec((dout, tm), lambda i: (0, i)),  # lane-dense out
        ),
        compiler_params=pltpu.CompilerParams(
            dimension_semantics=("parallel",)),
    )(u_t, w0_eff, b0_eff, w1, b1_c, w2, b2_c)

    return out_t.T                                                   # (N, dout)


def init_params(key):
    """Xavier-normal weights (gain=1), zero biases — matches init_weights()."""
    params = []
    for i in range(len(LAYERS) - 1):
        fan_in, fan_out = LAYERS[i], LAYERS[i + 1]
        key, sub = jax.random.split(key)
        std = (2.0 / (fan_in + fan_out)) ** 0.5
        # Stored as (in, out); equals PyTorch's (out, in) weight transposed.
        w = std * jax.random.normal(sub, (fan_in, fan_out), dtype=jnp.float32)
        b = jnp.zeros((fan_out,), dtype=jnp.float32)
        params.append((w, b))
    return params


def reference_forward(q, p, t, params, lb, ub):
    """Pure-JAX reference replicating the PyTorch forward."""
    u = jnp.concatenate([q, p, t], axis=1).astype(jnp.float32)
    a = (u - lb) / (ub - lb)
    for (w, b) in params[:-1]:
        a = jnp.tanh(a @ w + b)
    w, b = params[-1]
    return a @ w + b


if __name__ == "__main__":
    key = jax.random.PRNGKey(0)
    kq, kp, kt, kw = jax.random.split(key, 4)

    N = 200  # collocation-style points
    q = jax.random.uniform(kq, (N, 1), minval=Q_MIN, maxval=Q_MAX, dtype=jnp.float32)
    p = jax.random.uniform(kp, (N, 1), minval=P_MIN, maxval=P_MAX, dtype=jnp.float32)
    t = jax.random.uniform(kt, (N, 1), minval=T_MIN, maxval=T_MAX, dtype=jnp.float32)

    lb = jnp.array([[Q_MIN, P_MIN, T_MIN]], dtype=jnp.float32)
    ub = jnp.array([[Q_MAX, P_MAX, T_MAX]], dtype=jnp.float32)

    params = init_params(kw)

    out = pinn_forward(q, p, t, params, lb, ub)
    jax.block_until_ready(out)

    ref = reference_forward(q, p, t, params, lb, ub)
    assert out.shape == (N, LAYERS[-1])
    # bf16 matmul operands (v6e/v7x) change association/rounding vs the f32 ref.
    tol = 2e-2 if _USE_BF16_MATMUL else 1e-5
    assert jnp.allclose(out, ref, atol=tol, rtol=tol), "mismatch vs reference"

    # TODO(synk): loss_PDE needs d(output)/d(q,p,t); pl.pallas_call is not
    # auto-differentiable, so PDE-residual gradients need a custom_vjp (or use
    # reference_forward on gradient paths) rather than jax.grad of this kernel.
    print("KERNEL_OK")
</pallas_src>

<mosaic_0001>
module attributes {stable_mosaic.version = 11 : i64} {
  func.func @_pinn_kernel(%arg0: i32, %arg1: memref<3x256xf32, #tpu.memory_space<vmem>>, %arg2: memref<3x32xf32, #tpu.memory_space<vmem>>, %arg3: memref<32x1xf32, #tpu.memory_space<vmem>>, %arg4: memref<32x32xf32, #tpu.memory_space<vmem>>, %arg5: memref<32x1xf32, #tpu.memory_space<vmem>>, %arg6: memref<32x2xf32, #tpu.memory_space<vmem>>, %arg7: memref<2x1xf32, #tpu.memory_space<vmem>>, %arg8: memref<2x256xf32, #tpu.memory_space<vmem>>) attributes {dimension_semantics = [#tpu.dimension_semantics<parallel>], iteration_bounds = array<i64: 1>, scalar_prefetch = 0 : i64, scratch_operands = 0 : i64, tpu.core_type = #tpu.core_type<tc>, window_params = [{transform_indices = @transform_0, window_bounds = array<i64: 3, 256>}, {pipeline_mode = #tpu.pipeline_mode<synchronous>, transform_indices = @transform_1, window_bounds = array<i64: 3, 32>}, {pipeline_mode = #tpu.pipeline_mode<synchronous>, transform_indices = @transform_2, window_bounds = array<i64: 32, 1>}, {pipeline_mode = #tpu.pipeline_mode<synchronous>, transform_indices = @transform_3, window_bounds = array<i64: 32, 32>}, {pipeline_mode = #tpu.pipeline_mode<synchronous>, transform_indices = @transform_4, window_bounds = array<i64: 32, 1>}, {pipeline_mode = #tpu.pipeline_mode<synchronous>, transform_indices = @transform_5, window_bounds = array<i64: 32, 2>}, {pipeline_mode = #tpu.pipeline_mode<synchronous>, transform_indices = @transform_6, window_bounds = array<i64: 2, 1>}, {transform_indices = @transform_7, window_bounds = array<i64: 2, 256>}]} {
    %c0 = arith.constant 0 : index
    %c0_0 = arith.constant 0 : index
    %0 = vector.load %arg2[%c0, %c0_0] : memref<3x32xf32, #tpu.memory_space<vmem>>, vector<3x32xf32>
    %c0_1 = arith.constant 0 : index
    %c0_2 = arith.constant 0 : index
    %1 = vector.load %arg1[%c0_1, %c0_2] : memref<3x256xf32, #tpu.memory_space<vmem>>, vector<3x256xf32>
    %cst = arith.constant dense<0.000000e+00> : vector<32x256xf32>
    %2 = tpu.matmul %0, %1, %cst {dimension_numbers = #tpu.dot_dimension_numbers<[0], [0], [1], [1], [0, 1, 1, 1], [], []>} : vector<3x32xf32>, vector<3x256xf32>, vector<32x256xf32> -> vector<32x256xf32>
    %c0_3 = arith.constant 0 : index
    %c0_4 = arith.constant 0 : index
    %3 = vector.load %arg3[%c0_3, %c0_4] : memref<32x1xf32, #tpu.memory_space<vmem>>, vector<32x1xf32>
    %4 = vector.broadcast %3 : vector<32x1xf32> to vector<32x256xf32>
    %5 = arith.addf %2, %4 : vector<32x256xf32>
    %6 = math.tanh %5 : vector<32x256xf32>
    %c0_5 = arith.constant 0 : index
    %c0_6 = arith.constant 0 : index
    %7 = vector.load %arg4[%c0_5, %c0_6] : memref<32x32xf32, #tpu.memory_space<vmem>>, vector<32x32xf32>
    %cst_7 = arith.constant dense<0.000000e+00> : vector<32x256xf32>
    %8 = tpu.matmul %7, %6, %cst_7 {dimension_numbers = #tpu.dot_dimension_numbers<[0], [0], [1], [1], [0, 1, 1, 1], [], []>} : vector<32x32xf32>, vector<32x256xf32>, vector<32x256xf32> -> vector<32x256xf32>
    %c0_8 = arith.constant 0 : index
    %c0_9 = arith.constant 0 : index
    %9 = vector.load %arg5[%c0_8, %c0_9] : memref<32x1xf32, #tpu.memory_space<vmem>>, vector<32x1xf32>
    %10 = vector.broadcast %9 : vector<32x1xf32> to vector<32x256xf32>
    %11 = arith.addf %8, %10 : vector<32x256xf32>
    %12 = math.tanh %11 : vector<32x256xf32>
    %c0_10 = arith.constant 0 : index
    %c0_11 = arith.constant 0 : index
    %13 = vector.load %arg6[%c0_10, %c0_11] : memref<32x2xf32, #tpu.memory_space<vmem>>, vector<32x2xf32>
    %cst_12 = arith.constant dense<0.000000e+00> : vector<2x256xf32>
    %14 = tpu.matmul %13, %12, %cst_12 {dimension_numbers = #tpu.dot_dimension_numbers<[0], [0], [1], [1], [0, 1, 1, 1], [], []>} : vector<32x2xf32>, vector<32x256xf32>, vector<2x256xf32> -> vector<2x256xf32>
    %c0_13 = arith.constant 0 : index
    %c0_14 = arith.constant 0 : index
    %15 = vector.load %arg7[%c0_13, %c0_14] : memref<2x1xf32, #tpu.memory_space<vmem>>, vector<2x1xf32>
    %16 = vector.broadcast %15 : vector<2x1xf32> to vector<2x256xf32>
    %17 = arith.addf %14, %16 : vector<2x256xf32>
    %c0_15 = arith.constant 0 : index
    %c0_16 = arith.constant 0 : index
    %18 = vector.load %arg8[%c0_15, %c0_16] : memref<2x256xf32, #tpu.memory_space<vmem>>, vector<2x256xf32>
    tpu.vector_store %arg8[%c0_15, %c0_16], %17 {strides = array<i32>} : memref<2x256xf32, #tpu.memory_space<vmem>>, vector<2x256xf32>,
    return
  }
  func.func @transform_0(%arg0: i32) -> (i32, i32) {
    %c0_i32 = arith.constant 0 : i32
    %c0_i32_0 = arith.constant 0 : i32
    return %c0_i32, %arg0 : i32, i32
  }
  func.func @transform_1(%arg0: i32) -> (i32, i32) {
    %c0_i32 = arith.constant 0 : i32
    %c0_i32_0 = arith.constant 0 : i32
    %c0_i32_1 = arith.constant 0 : i32
    return %c0_i32, %c0_i32_0 : i32, i32
  }
  func.func @transform_2(%arg0: i32) -> (i32, i32) {
    %c0_i32 = arith.constant 0 : i32
    %c0_i32_0 = arith.constant 0 : i32
    %c0_i32_1 = arith.constant 0 : i32
    return %c0_i32, %c0_i32_0 : i32, i32
  }
  func.func @transform_3(%arg0: i32) -> (i32, i32) {
    %c0_i32 = arith.constant 0 : i32
    %c0_i32_0 = arith.constant 0 : i32
    %c0_i32_1 = arith.constant 0 : i32
    return %c0_i32, %c0_i32_0 : i32, i32
  }
  func.func @transform_4(%arg0: i32) -> (i32, i32) {
    %c0_i32 = arith.constant 0 : i32
    %c0_i32_0 = arith.constant 0 : i32
    %c0_i32_1 = arith.constant 0 : i32
    return %c0_i32, %c0_i32_0 : i32, i32
  }
  func.func @transform_5(%arg0: i32) -> (i32, i32) {
    %c0_i32 = arith.constant 0 : i32
    %c0_i32_0 = arith.constant 0 : i32
    %c0_i32_1 = arith.constant 0 : i32
    return %c0_i32, %c0_i32_0 : i32, i32
  }
  func.func @transform_6(%arg0: i32) -> (i32, i32) {
    %c0_i32 = arith.constant 0 : i32
    %c0_i32_0 = arith.constant 0 : i32
    %c0_i32_1 = arith.constant 0 : i32
    return %c0_i32, %c0_i32_0 : i32, i32
  }
  func.func @transform_7(%arg0: i32) -> (i32, i32) {
    %c0_i32 = arith.constant 0 : i32
    %c0_i32_0 = arith.constant 0 : i32
    return %c0_i32, %arg0 : i32, i32
  }
}

</mosaic_0001>

<bundles_post_ra>
// kernel: pinn_forward.1
= control target key start
LH: loop header
LB: loop body
LE: loop exit
PB: predicated region body
PF: predicated region fallthrough
CT: control target
= control target key end

     0   :  { %v586_v2 = vmov 0   ;;  %vm100_vm0 = vcmask 1042432   ;;  %v587_v5 = vmov 0.0   ;;  %s703_s0 = inlined_call_operand.vmem [shape: f32[3,200], index: 0, kind: input, shape index: {}]   ;;  %s704_s1 = inlined_call_operand.vmem [shape: f32[3,32], index: 1, kind: input, shape index: {}]   ;;  %s705_s2 = inlined_call_operand.vmem [shape: f32[32,1], index: 2, kind: input, shape index: {}]   ;;  %s706_s3 = inlined_call_operand.vmem [shape: f32[32,32], index: 3, kind: input, shape index: {}]   ;;  %s707_s4 = inlined_call_operand.vmem [shape: f32[32,1], index: 4, kind: input, shape index: {}]   ;;  %s708_s5 = inlined_call_operand.vmem [shape: f32[32,2], index: 5, kind: input, shape index: {}]   ;;  %s709_s6 = inlined_call_operand.vmem [shape: f32[2,1], index: 6, kind: input, shape index: {}]   ;;  %s710_s7 = inlined_call_operand.hbm [shape: f32[2,200], index: 7, kind: output, shape index: {}]  }
   0x1   :  { %v27_v0 = vld [vmem:[%s704_s1] sm:$0x7]  ;;  %v31_v1 = vld [vmem:[%s705_s2 + $0x10] sm:$0xff]  ;;  %530 = vset.pattern.permute.xlu1 %v586_v2  ;;  %169 = vmatprep.mubr.f32.mxu0 %v587_v5 }
   0x2   :  { %53 = vxpose.xlu0.b32.start.end [1/1] (short) (narrow) %v27_v0, 32  ;;  %v28_v3 = vld [vmem:[%s703_s0] sm:$0x77]  ;;  %45 = vperm.xlu1 %530, %v31_v1  }
   0x3   :  { %v86_v4 = vcombine.high %v28_v3, %v28_v3 }
   0x4   :  { %12 = vsyncpa [#allocation3], 0  ;;  %v30_v6 = vld [vmem:[%s705_s2 + $0x8] sm:$0xff]  ;;  %339 = vmatprep.mubr.f32.mxu1 %v587_v5  ;;  %v29_v7 = vld [vmem:[%s705_s2] sm:$0xff]  ;;  %vm87_vm1 = vcmask 23552   ;;  %vm262_vm2 = vcmask 261120  }
   0x5   :  { %514 = vmatprep.subr.msk.mxu0 %vm100_vm0, %v86_v4  ;;  %v202_v8 = vld [vmem:[%s706_s3] sm:$0xff]  ;;  %v32_v9 = vld [vmem:[%s705_s2 + $0x18] sm:$0xff]  ;;  %v203_v10 = vld [vmem:[%s706_s3 + $0x8] sm:$0xff] }
   0x6   :  { %515 = vmatpush1.msk.msra.mxu0 %vm100_vm0, %v28_v3  ;;  %40 = vperm.xlu1 %530, %v30_v6   ;;  %v209_v11 = vld [vmem:[%s707_s4 + $0x18] sm:$0xff]  ;;  %v204_v12 = vld [vmem:[%s706_s3 + $0x10] sm:$0xff]  ;;  %v207_v15 = vld [vmem:[%s707_s4 + $0x8] sm:$0xff] }
   0x7   :  { %v208_v13 = vld [vmem:[%s707_s4 + $0x10] sm:$0xff]  ;;  %v205_v14 = vld [vmem:[%s706_s3 + $0x18] sm:$0xff]  ;;  %v206_v16 = vld [vmem:[%s707_s4] sm:$0xff] }
   0x8   :  { %v376_v17 = vld [vmem:[%s709_s6] sm:$0x3]  ;;  %v373_v23 = vld [vmem:[%s708_s5 + $0x8] sm:$0xff]  ;;  %v374_v24 = vld [vmem:[%s708_s5 + $0x10] sm:$0xff] }
   0x9   :  { %v372_v22 = vld [vmem:[%s708_s5] sm:$0xff]  ;;  %v375_v25 = vld [vmem:[%s708_s5 + $0x18] sm:$0xff]  ;;  %s588_s5 = smov [#allocation2]  }
   0xa   :  { %35 = vperm.xlu1 %530, %v29_v7   ;;  %s506_s9 = sshll.u32 %s588_s5, 4  ;;  %s507_s9 = int_to_ptr.vmem [resolvable:$true] %s506_s9 }
   0xb   :  { %s564_s0 = scalar_lea.vmem %s507_s9, 64  ;;  %p569_p1 = scmp.lt.s32.totalorder %s507_s9, %s507_s9 }
   0xc   :  { %p565_p0 = scmp.ne.s32.totalorder %s507_s9, %s564_s0  ;;  %p570_p2 = scmp.lt.s32.totalorder %s564_s0, %s564_s0 }
   0xe   :  { %p571_p3 = por %p570_p2, %p569_p1 }
  0x10   :  { %p572_p4 = pnand %p571_p3, %p565_p0 }
  0x2b   :  { %529 = vset.pattern.permute.xlu0 %v586_v2 }
  0x33   :  { %230 = vxpose.xlu1.b32.start [1/4] (short) (narrow) %v202_v8, 32 }
  0x37   :  { %50 = vperm.xlu0 %529, %v32_v9   ;;  %231 = vxpose.xlu1.b32.cont [2/4] (short) (narrow) %v203_v10, 32 }
  0x3b   :  { %227 = vperm.xlu0 %529, %v209_v11   ;;  %232 = vxpose.xlu1.b32.cont [3/4] (short) (narrow) %v204_v12, 32 }
  0x3f   :  { %222 = vperm.xlu0 %529, %v208_v13   ;;  %233 = vxpose.xlu1.b32.end [4/4] (short) (narrow) %v205_v14, 32 }
  0x43   :  { %217 = vperm.xlu0 %529, %v207_v15  }
  0x5d   :  { %212 = vperm.xlu1 %530, %v206_v16  }
  0x61   :  { %379 = vperm.xlu1 %530, %v376_v17   ;;  %382 = vxpose.xlu0.b32.start [1/4] (short) (narrow) %v372_v22, 8 }
  0x65   :  { %383 = vxpose.xlu0.b32.cont [2/4] (short) (narrow) %v373_v23, 8 }
  0x69   :  { %384 = vxpose.xlu0.b32.cont [3/4] (short) (narrow) %v374_v24, 8 }
  0x6d   :  { %385 = vxpose.xlu0.b32.end [4/4] (short) (narrow) %v375_v25, 8 }
  0x7d   :  { %v46_v29 = vpop.permute.xlu1 %45 }
  0x7e   :  { %v69_v18 = vpop.trf.xlu0 }
  0x7f   :  { %516 = vmatmul.mubr.msk.f32.vlgmr.msra.gmra.mxu0 %vm87_vm1, %v69_v18 }
  0x80   :  { %175 = vmatprep.mubr.f32.mxu0 %v587_v5 }
  0x81   :  { %v41_v33 = vpop.permute.xlu1 %40 }
  0x82   :  { %v70_v19 = vpop.trf.xlu0 }
  0x83   :  { %517 = vmatmul.mubr.msk.f32.gmra.mxu0 %vm87_vm1, %v70_v19 }
  0x84   :  { %181 = vmatprep.mubr.f32.mxu0 %v587_v5 }
  0x85   :  { %v36_v42 = vpop.permute.xlu1 %35 }
  0x86   :  { %v71_v20 = vpop.trf.xlu0 }
  0x87   :  { %518 = vmatmul.mubr.msk.f32.gmra.mxu0 %vm87_vm1, %v71_v20 }
  0x88   :  { %187 = vmatprep.mubr.f32.mxu0 %v587_v5 }
  0x8a   :  { %v72_v21 = vpop.trf.xlu0 }
  0x8b   :  { %519 = vmatmul.mubr.msk.f32.gmra.mxu0 %vm87_vm1, %v72_v21 }
  0x8c   :  { %481 = vmatprep.mubr.f32.mxu0 %v587_v5 }
  0xaf   :  { %v246_v49 = vpop.trf.xlu1 }
  0xb2   :  { %v51_v35 = vpop.permute.xlu0 %50 }
  0xb3   :  { %v247_v55 = vpop.trf.xlu1 }
  0xb6   :  { %v228_v60 = vpop.permute.xlu0 %227 }
  0xb7   :  { %v248_v56 = vpop.trf.xlu1 }
  0xba   :  { %v223_v0 = vpop.permute.xlu0 %222 }
  0xbb   :  { %v249_v57 = vpop.trf.xlu1 }
  0xbe   :  { %v218_v8 = vpop.permute.xlu0 %217 }
  0xdd   :  { %v398_v21 = vpop.trf.xlu0 }
 0x13f   :  { %v171_v26 = vpop.f32.mrf.mxu0 }
 0x140   :  { %v172_v45 = vadd.f32 %v171_v26, %v36_v42 }
 0x141   :  { %v173_v27 = vpop.f32.mrf.mxu0 }
 0x142   :  { %v174_v44 = vadd.f32 %v173_v27, %v36_v42 }
 0x143   :  { %v177_v28 = vpop.f32.mrf.mxu0 }
 0x144   :  { %v178_v43 = vadd.f32 %v177_v28, %v41_v33 }
 0x145   :  { %v179_v30 = vpop.f32.mrf.mxu0 }
 0x146   :  { %v180_v41 = vadd.f32 %v179_v30, %v41_v33 }
 0x147   :  { %v183_v31 = vpop.f32.mrf.mxu0 }
 0x148   :  { %v184_v40 = vadd.f32 %v183_v31, %v46_v29 }
 0x149   :  { %v185_v32 = vpop.f32.mrf.mxu0 }
 0x14a   :  { %v186_v38 = vadd.f32 %v185_v32, %v46_v29 }
 0x14b   :  { %v189_v34 = vpop.f32.mrf.mxu0 }
 0x14c   :  { %v190_v36 = vadd.f32 %v189_v34, %v51_v35 }
 0x14d   :  { %v191_v37 = vpop.f32.mrf.mxu0 }
 0x14e   :  { %v192_v39 = vadd.f32 %v191_v37, %v51_v35 }
 0x150   :  { %532 = vtanh.f32 %v192_v39 }
 0x151   :  { %534 = vtanh.f32 %v190_v36 }
 0x152   :  { %536 = vtanh.f32 %v186_v38 }
 0x153   :  { %538 = vtanh.f32 %v184_v40 }
 0x154   :  { %540 = vtanh.f32 %v180_v41 }
 0x155   :  { %542 = vtanh.f32 %v178_v43 }
 0x156   :  { %544 = vtanh.f32 %v174_v44 }
 0x157   :  { %546 = vtanh.f32 %v172_v45 }
 0x15d   :  { %v533_v46 = vpop.eup %532 }
 0x15e   :  { %v535_v47 = vpop.eup %534  ;;  %299 = vmatprep.subr.mxu1 %v533_v46 }
 0x15f   :  { %v537_v48 = vpop.eup %536  ;;  %300 = vmatpush1.msra.mxu1 %v535_v47 }
 0x160   :  { %v539_v50 = vpop.eup %538  ;;  %301 = vmatprep.subr.mxu1 %v537_v48 }
 0x161   :  { %v541_v51 = vpop.eup %540  ;;  %302 = vmatpush1.msra.mxu1 %v539_v50 }
 0x162   :  { %v543_v52 = vpop.eup %542  ;;  %303 = vmatprep.subr.mxu1 %v541_v51 }
 0x163   :  { %v545_v53 = vpop.eup %544  ;;  %304 = vmatpush1.msra.mxu1 %v543_v52 }
 0x164   :  { %v547_v54 = vpop.eup %546  ;;  %305 = vmatprep.subr.mxu1 %v545_v53 }
 0x165   :  { %306 = vmatpush1.msra.mxu1 %v547_v54 }
 0x166   :  { %520 = vmatmul.mubr.msk.f32.vlgmr.msra.gmra.mxu1 %vm262_vm2, %v246_v49 }
 0x167   :  { %345 = vmatprep.mubr.f32.mxu1 %v587_v5 }
 0x16a   :  { %521 = vmatmul.mubr.msk.f32.gmra.mxu1 %vm262_vm2, %v247_v55 }
 0x16b   :  { %351 = vmatprep.mubr.f32.mxu1 %v587_v5 }
 0x16e   :  { %522 = vmatmul.mubr.msk.f32.gmra.mxu1 %vm262_vm2, %v248_v56 }
 0x16f   :  { %357 = vmatprep.mubr.f32.mxu1 %v587_v5  ;;  %v213_v5 = vpop.permute.xlu1 %212 }
 0x172   :  { %523 = vmatmul.mubr.msk.f32.gmra.mxu1 %vm262_vm2, %v249_v57 }
 0x173   :  { %v380_v24 = vpop.permute.xlu1 %379 }
 0x226   :  { %v341_v58 = vpop.f32.mrf.mxu1 }
 0x227   :  { %v342_v13 = vadd.f32 %v341_v58, %v213_v5 }
 0x228   :  { %v343_v59 = vpop.f32.mrf.mxu1 }
 0x229   :  { %v344_v12 = vadd.f32 %v343_v59, %v213_v5 }
 0x22a   :  { %v347_v61 = vpop.f32.mrf.mxu1 }
 0x22b   :  { %v348_v11 = vadd.f32 %v347_v61, %v218_v8 }
 0x22c   :  { %v349_v62 = vpop.f32.mrf.mxu1 }
 0x22d   :  { %v350_v10 = vadd.f32 %v349_v62, %v218_v8 }
 0x22e   :  { %v353_v63 = vpop.f32.mrf.mxu1 }
 0x22f   :  { %v354_v9 = vadd.f32 %v353_v63, %v223_v0 }
 0x230   :  { %v355_v1 = vpop.f32.mrf.mxu1 }
 0x231   :  { %v356_v6 = vadd.f32 %v355_v1, %v223_v0 }
 0x232   :  { %v359_v2 = vpop.f32.mrf.mxu1 }
 0x233   :  { %v360_v3 = vadd.f32 %v359_v2, %v228_v60 }
 0x234   :  { %v361_v4 = vpop.f32.mrf.mxu1 }
 0x235   :  { %v362_v7 = vadd.f32 %v361_v4, %v228_v60 }
 0x237   :  { %548 = vtanh.f32 %v362_v7 }
 0x238   :  { %550 = vtanh.f32 %v360_v3 }
 0x239   :  { %552 = vtanh.f32 %v356_v6 }
 0x23a   :  { %554 = vtanh.f32 %v354_v9 }
 0x23b   :  { %556 = vtanh.f32 %v350_v10 }
 0x23c   :  { %558 = vtanh.f32 %v348_v11 }
 0x23d   :  { %560 = vtanh.f32 %v344_v12 }
 0x23e   :  { %562 = vtanh.f32 %v342_v13 }
 0x244   :  { %v549_v14 = vpop.eup %548 }
 0x245   :  { %v551_v15 = vpop.eup %550  ;;  %441 = vmatprep.subr.mxu0 %v549_v14 }
 0x246   :  { %v553_v16 = vpop.eup %552  ;;  %442 = vmatpush1.msra.mxu0 %v551_v15 }
 0x247   :  { %v555_v17 = vpop.eup %554  ;;  %443 = vmatprep.subr.mxu0 %v553_v16 }
 0x248   :  { %v557_v18 = vpop.eup %556  ;;  %444 = vmatpush1.msra.mxu0 %v555_v17 }
 0x249   :  { %v559_v19 = vpop.eup %558  ;;  %445 = vmatprep.subr.mxu0 %v557_v18 }
 0x24a   :  { %v561_v20 = vpop.eup %560  ;;  %446 = vmatpush1.msra.mxu0 %v559_v19 }
 0x24b   :  { %v563_v22 = vpop.eup %562  ;;  %447 = vmatprep.subr.mxu0 %v561_v20 }
 0x24c   :  { %448 = vmatpush1.msra.mxu0 %v563_v22 }
 0x24d   :  { %524 = vmatmul.mubr.msk.f32.vlgmr.msra.gmra.mxu0 %vm262_vm2, %v398_v21 }
 0x30d   :  { %v483_v23 = vpop.f32.mrf.mxu0 }
 0x30e   :  { %v484_v26 = vadd.f32 %v483_v23, %v380_v24 }
 0x30f   :  { %v485_v25 = vpop.f32.mrf.mxu0 }
 0x310   :  { %v486_v27 = vadd.f32 %v485_v25, %v380_v24 }
 0x312   :  { %v490_v28 = vcombine.low %v484_v26, %v486_v27 }
 0x314   :  { %525 = vst.sshfl [vmem:[#allocation2] sm:$0x33 pattern:$0x76325410] %v490_v28 }
 0x315   :  { %575 = shalt.err (!%p572_p4)
}
 0x316   :  { %509 = dma.vmem_to_hbm [thread:$0]  %s507_s9, 64, %s710_s7, [#allocation3]  }
 0x317   :  { %584 = dma.done.wait [#allocation3], 64  }
 0x318   :  { %585 = vsyncadd [#allocation3], 4294967232 }
 0x319   :  { %513 = vsyncpa [#allocation3], 1 }

</bundles_post_ra>
